<compile_context>
chip_gen: v5e
topology: v5e:2x2
jax: 0.10.0
libtpu: 0.0.40
codegen_flags: <defaults>
</compile_context>

<pallas_src>
import jax
import jax.numpy as jnp
from jax import lax
from jax.experimental import pallas as pl
from jax.experimental.pallas import tpu as pltpu

_LANE = 128
_VMEM_LIMIT = 48 * 1024 * 1024   # leave headroom below v7x's 64 MiB physical VMEM


def _round_up(x, m):
    return ((x + m - 1) // m) * m


def _pick_tile(dim_p, pref):
    """Largest multiple-of-128 tile <= pref that evenly divides dim_p (a 128-multiple)."""
    t = min(pref, dim_p)
    while dim_p % t:
        t -= _LANE
    return t


# ----------------------------------------------------------------------------
# Pallas kernels
# ----------------------------------------------------------------------------
def _tl1_gram_kernel(rho_ref, xa_ref, xb_ref, sqa_ref, sqb_ref, k_ref):
    """One (TM, TN) tile of K[i,j] = max(rho - ||xa[:,i] - xb[:,j]||_2, 0).

    xa_ref : (M, TM)  column block of set A (feature axis on sublanes)
    xb_ref : (M, TN)  column block of set B
    sqa_ref: (TM, 1)  precomputed ||xa[:,i]||^2
    sqb_ref: (1, TN)  precomputed ||xb[:,j]||^2
    k_ref  : (TM, TN)
    """
    rho = rho_ref[0, 0]                                   # scalar from SMEM
    # Cross term on the MXU, contracting the feature axis (no wrapper transpose).
    g = lax.dot_general(xa_ref[...], xb_ref[...],
                        dimension_numbers=(((0,), (0,)), ((), ())),
                        preferred_element_type=jnp.float32)        # (TM, TN)
    d2 = jnp.maximum(sqa_ref[...] + sqb_ref[...] - 2.0 * g, 0.0)
    k_ref[...] = jnp.maximum(rho - jnp.sqrt(d2), 0.0)


def _tl1_predict_kernel(beta_ref, alpha_c_ref, alpha_full_ref, kval_ref, ktr_ref,
                        y_ref, tkn_ref, anorm_ref, acc_y, acc_tkn):
    """Streams K row-blocks along the N reduction axis.

    alpha_c_ref   : (1, TK)   chunk of alpha matching the current K row-block
    alpha_full_ref: (1, Np)   full (padded) alpha, used to weight alpha@K_train
    kval_ref      : (TK, Nvp) row block of K_val
    ktr_ref       : (TK, Np)  row block of K_train
    """
    k = pl.program_id(0)

    @pl.when(k == 0)
    def _init():
        acc_y[...] = jnp.zeros_like(acc_y)
        acc_tkn[...] = jnp.zeros_like(acc_tkn)

    a_c = alpha_c_ref[...]                                  # (1, TK)
    a_full = alpha_full_ref[...]                            # (1, Np)
    acc_y[...] += jnp.dot(a_c, kval_ref[...],
                          preferred_element_type=jnp.float32)          # (1, Nvp)
    ak = jnp.dot(a_c, ktr_ref[...], preferred_element_type=jnp.float32)  # (1, Np)
    acc_tkn[...] += jnp.sum(ak * a_full, axis=1, keepdims=True)          # (1, 1)

    @pl.when(k == pl.num_programs(0) - 1)
    def _fini():
        y_ref[...] = acc_y[...] + beta_ref[0, 0]
        tkn_ref[...] = acc_tkn[...]
        anorm_ref[...] = jnp.sqrt(jnp.sum(a_full * a_full, axis=1, keepdims=True))


# ----------------------------------------------------------------------------
# Wrappers around pallas_call
# ----------------------------------------------------------------------------
def tl1_pairwise_kernel(x_a, x_b, rho, *, tile=512):
    """x_a: (M, Na), x_b: (M, Nb) -> padded (Na_p, Nb_p) TL1 kernel matrix
    (Na_p, Nb_p are Na, Nb rounded up to multiples of 128; caller slices if needed)."""
    M, Na = x_a.shape
    M2, Nb = x_b.shape
    assert M == M2
    Na_p = _round_up(Na, _LANE)
    Nb_p = _round_up(Nb, _LANE)

    xa = jnp.pad(x_a.astype(jnp.float32), ((0, 0), (0, Na_p - Na)))
    xb = jnp.pad(x_b.astype(jnp.float32), ((0, 0), (0, Nb_p - Nb)))
    # Hoisted squared column norms (computed once, streamed per tile).
    sqa = jnp.sum(xa * xa, axis=0).reshape(Na_p, 1)
    sqb = jnp.sum(xb * xb, axis=0).reshape(1, Nb_p)
    rho_arr = jnp.full((1, 1), rho, dtype=jnp.float32)

    tm = _pick_tile(Na_p, tile)
    tn = _pick_tile(Nb_p, tile)
    grid = (Na_p // tm, Nb_p // tn)

    return pl.pallas_call(
        _tl1_gram_kernel,
        out_shape=jax.ShapeDtypeStruct((Na_p, Nb_p), jnp.float32),
        grid_spec=pltpu.PrefetchScalarGridSpec(
            num_scalar_prefetch=0,
            grid=grid,
            in_specs=[
                pl.BlockSpec((1, 1), lambda i, j: (0, 0),
                             memory_space=pltpu.MemorySpace.SMEM),   # rho
                pl.BlockSpec((M, tm), lambda i, j: (0, i)),          # x_a cols
                pl.BlockSpec((M, tn), lambda i, j: (0, j)),          # x_b cols
                pl.BlockSpec((tm, 1), lambda i, j: (i, 0)),          # ||a||^2
                pl.BlockSpec((1, tn), lambda i, j: (0, j)),          # ||b||^2
            ],
            out_specs=pl.BlockSpec((tm, tn), lambda i, j: (i, j)),
        ),
        compiler_params=pltpu.CompilerParams(
            dimension_semantics=("parallel", "parallel"),
            vmem_limit_bytes=_VMEM_LIMIT,
        ),
    )(rho_arr, xa, xb, sqa, sqb)


def tl1_predict(alpha_p, k_val_p, k_train_p, beta, *, tile=256):
    """alpha_p: (1, Np) zero-padded, k_val_p: (Np, Nvp), k_train_p: (Np, Np)
    -> (y_pred_p (1, Nvp), train_ker_norm (1, 1), alpha_norm (1, 1))."""
    _, Np = alpha_p.shape
    Np2, Nvp = k_val_p.shape
    assert Np == Np2 == k_train_p.shape[0] == k_train_p.shape[1]
    tk = _pick_tile(Np, tile)
    grid = (Np // tk,)
    beta_arr = jnp.full((1, 1), beta, dtype=jnp.float32)

    return pl.pallas_call(
        _tl1_predict_kernel,
        out_shape=(
            jax.ShapeDtypeStruct((1, Nvp), jnp.float32),   # y_pred (padded)
            jax.ShapeDtypeStruct((1, 1), jnp.float32),     # train_ker_norm
            jax.ShapeDtypeStruct((1, 1), jnp.float32),     # alpha_norm
        ),
        grid_spec=pltpu.PrefetchScalarGridSpec(
            num_scalar_prefetch=0,
            grid=grid,
            in_specs=[
                pl.BlockSpec((1, 1), lambda k: (0, 0),
                             memory_space=pltpu.MemorySpace.SMEM),   # beta
                pl.BlockSpec((1, tk), lambda k: (0, k)),             # alpha chunk
                pl.BlockSpec((1, Np), lambda k: (0, 0)),             # full alpha
                pl.BlockSpec((tk, Nvp), lambda k: (k, 0)),           # K_val rows
                pl.BlockSpec((tk, Np), lambda k: (k, 0)),            # K_train rows
            ],
            out_specs=(
                pl.BlockSpec((1, Nvp), lambda k: (0, 0)),
                pl.BlockSpec((1, 1), lambda k: (0, 0)),
                pl.BlockSpec((1, 1), lambda k: (0, 0)),
            ),
            scratch_shapes=[
                pltpu.VMEM((1, Nvp), jnp.float32),   # acc for alpha @ K_val
                pltpu.VMEM((1, 1), jnp.float32),     # acc for alpha @ K_train @ alpha^T
            ],
        ),
        compiler_params=pltpu.CompilerParams(
            dimension_semantics=("arbitrary",),      # reduction over K row-blocks
            vmem_limit_bytes=_VMEM_LIMIT,
        ),
    )(beta_arr, alpha_p, alpha_p, k_val_p, k_train_p)


# ----------------------------------------------------------------------------
# Module equivalent
# ----------------------------------------------------------------------------
class TL1RegressorPallas:
    def __init__(self, x_train, y_train, rho=1.0, lamda=0.1):
        # x_train: (feature_dim M, num_samples N) -- torch convention
        self.x_train = jnp.asarray(x_train, dtype=jnp.float32)
        self.y_train = jnp.asarray(y_train, dtype=jnp.float32).reshape(-1)
        self.feature_dim = self.x_train.shape[0]
        self.num_samples = self.x_train.shape[1]
        # deterministic parameter init, as in __init__
        self.lamda = jnp.float32(lamda)                      # nn.Parameter scalar
        self.alpha = jnp.ones((1, self.num_samples), jnp.float32)
        self.beta = jnp.float32(0.0)
        self.rho = jnp.float32(rho) * self.feature_dim       # rho * feature_dim
        self.train_ker_norm = jnp.float32(0.0)
        self.alpha_norm = jnp.float32(0.0)

    def forward(self, x_val):
        assert x_val.shape[0] == self.x_train.shape[0], \
            'but found {} and {}'.format(x_val.shape[0], self.x_train.shape[0])
        x_val = jnp.asarray(x_val, dtype=jnp.float32)
        N = self.num_samples
        Nv = x_val.shape[1]

        # TL1 kernel matrices (Pallas, tiled / pipelined; padded to 128-multiples).
        k_train_p = tl1_pairwise_kernel(self.x_train, self.x_train, self.rho)  # (Np, Np)
        k_val_p = tl1_pairwise_kernel(self.x_train, x_val, self.rho)           # (Np, Nvp)
        self._k_train_p = k_train_p
        self._k_val_p = k_val_p
        Np = k_train_p.shape[0]

        # Ridge solve for alpha (glue; no Pallas dense-solve primitive).
        # alpha = ele1 @ inv(ele2); ele2 is symmetric, so solve the SPD system instead.
        # TODO(synk): torch promotes ele2 to float64 via eye(dtype=double); solved in float32 here.
        k_train = k_train_p[:N, :N]
        ele1 = self.y_train.reshape(1, N) - self.beta                          # (1, N)
        ele2 = k_train + self.lamda * jnp.eye(N, dtype=jnp.float32)            # (N, N)
        alpha = jnp.linalg.solve(ele2, ele1.T).T                               # (1, N)
        self.alpha = alpha

        # Prediction + norms (Pallas). Zero-padded alpha kills padded rows' contribution.
        alpha_p = jnp.pad(alpha, ((0, 0), (0, Np - N)))
        y_pred_p, tkn, anorm = tl1_predict(alpha_p, k_val_p, k_train_p, self.beta)
        self.train_ker_norm = tkn                 # (1, 1), matches torch's (1, 1)
        self.alpha_norm = anorm[0, 0]             # scalar, matches torch.norm(alpha)
        return y_pred_p[:, :Nv]                   # (1, N_val)

    __call__ = forward


# ----------------------------------------------------------------------------
# Pure-JAX references (for validation)
# ----------------------------------------------------------------------------
def _reference_gram(x_a, x_b, rho):
    """Direct pairwise-difference TL1 kernel (torch-spec formula)."""
    diff = x_a[:, :, None] - x_b[:, None, :]                 # (M, Na, Nb)
    d = jnp.sqrt(jnp.sum(diff * diff, axis=0))
    return jnp.maximum(rho - d, 0.0)


def _reference_forward(x_train, y_train, x_val, rho, lamda, beta=0.0):
    hp = lax.Precision.HIGHEST
    N = x_train.shape[1]
    k_tr = _reference_gram(x_train, x_train, rho)
    k_val = _reference_gram(x_train, x_val, rho)
    ele1 = y_train.reshape(1, N) - beta
    ele2 = k_tr + lamda * jnp.eye(N, dtype=jnp.float32)
    alpha = jnp.linalg.solve(ele2, ele1.T).T
    y_pred = jnp.matmul(alpha, k_val, precision=hp) + beta
    tkn = jnp.matmul(jnp.matmul(alpha, k_tr, precision=hp), alpha.T, precision=hp)
    a_norm = jnp.sqrt(jnp.sum(alpha * alpha))
    return y_pred, tkn, a_norm


def _check_predict_stage(model, n, nv, tol=1e-3):
    """Tight check of the Pallas predict kernel given the Pallas-produced K matrices."""
    hp = lax.Precision.HIGHEST
    k_tr = model._k_train_p[:n, :n]
    k_v = model._k_val_p[:n, :nv]
    y_chk = jnp.matmul(model.alpha, k_v, precision=hp) + model.beta
    tkn_chk = jnp.matmul(jnp.matmul(model.alpha, k_tr, precision=hp),
                         model.alpha.T, precision=hp)
    an_chk = jnp.sqrt(jnp.sum(model.alpha * model.alpha))
    y_pal = jnp.matmul(model.alpha, k_v, precision=hp)  # placeholder to keep shapes clear
    del y_pal
    assert bool(jnp.allclose(model._last_y_pred, y_chk, rtol=tol, atol=tol))
    assert bool(jnp.allclose(model.train_ker_norm, tkn_chk, rtol=tol, atol=tol))
    assert bool(jnp.allclose(model.alpha_norm, an_chk, rtol=tol, atol=tol))


# ----------------------------------------------------------------------------
if __name__ == "__main__":
    key = jax.random.PRNGKey(0)
    k1, k2, k3, k4, k5 = jax.random.split(key, 5)

    # (a) Tiled gram kernel vs direct-formula reference on a multi-tile grid
    #     (tile=128 forces a (3, 2) grid; ragged Na/Nb exercise the padding path).
    M, Na, Nb = 16, 300, 200
    xa = jax.random.normal(k4, (M, Na), dtype=jnp.float32)
    xb = jax.random.normal(k5, (M, Nb), dtype=jnp.float32)
    rho = jnp.float32(1.0) * M
    k_pal = tl1_pairwise_kernel(xa, xb, rho, tile=128)[:Na, :Nb]
    k_pal = jax.block_until_ready(k_pal)
    k_ref = _reference_gram(xa, xb, rho)
    assert k_pal.shape == (Na, Nb)
    assert bool(jnp.allclose(k_pal, k_ref, rtol=1e-3, atol=1e-3))

    # (b) Full forward at small module-consistent shapes.
    M, N, N_val = 16, 32, 8
    x_train = jax.random.normal(k1, (M, N), dtype=jnp.float32)
    y_train = jax.random.normal(k2, (N,), dtype=jnp.float32)
    x_val = jax.random.normal(k3, (M, N_val), dtype=jnp.float32)

    model = TL1RegressorPallas(x_train, y_train, rho=1.0, lamda=0.1)
    y_pred = jax.block_until_ready(model(x_val))
    model._last_y_pred = y_pred
    jax.block_until_ready(model.train_ker_norm)
    jax.block_until_ready(model.alpha_norm)

    assert y_pred.shape == (1, N_val), y_pred.shape
    assert bool(jnp.all(jnp.isfinite(y_pred)))
    # Tight check of the predict kernel (same K / alpha as the Pallas path).
    _check_predict_stage(model, N, N_val)
    # Loose end-to-end check vs the torch-spec (direct-difference) formula; the
    # diagonal of K_train differs by O(sqrt(f32 eps)) between the dot-trick and the
    # direct formula, which the ridge solve can amplify slightly -> generous tolerance.
    y_ref, _, _ = _reference_forward(x_train, y_train, x_val, model.rho, model.lamda)
    assert bool(jnp.allclose(y_pred, y_ref, rtol=1e-1, atol=1e-1))

    # (c) Larger forward so the predict reduction grid has multiple steps (Np=384, tk=128).
    N2, Nv2 = 300, 40
    x_train2 = jax.random.normal(k4, (M, N2), dtype=jnp.float32)
    y_train2 = jax.random.normal(k5, (N2,), dtype=jnp.float32)
    x_val2 = jax.random.normal(k3, (M, Nv2), dtype=jnp.float32)
    model2 = TL1RegressorPallas(x_train2, y_train2, rho=1.0, lamda=0.1)
    y_pred2 = jax.block_until_ready(model2(x_val2))
    model2._last_y_pred = y_pred2
    assert y_pred2.shape == (1, Nv2)
    assert bool(jnp.all(jnp.isfinite(y_pred2)))
    _check_predict_stage(model2, N2, Nv2)
    y_ref2, _, _ = _reference_forward(x_train2, y_train2, x_val2, model2.rho, model2.lamda)
    assert bool(jnp.allclose(y_pred2, y_ref2, rtol=1e-1, atol=1e-1))

    print("KERNEL_OK")
</pallas_src>

<mosaic_0001>
module attributes {stable_mosaic.version = 11 : i64} {
  func.func @_tl1_gram_kernel(%arg0: i32, %arg1: i32, %arg2: memref<1x1xf32, #tpu.memory_space<smem>>, %arg3: memref<16x128xf32, #tpu.memory_space<vmem>>, %arg4: memref<16x128xf32, #tpu.memory_space<vmem>>, %arg5: memref<128x1xf32, #tpu.memory_space<vmem>>, %arg6: memref<1x128xf32, #tpu.memory_space<vmem>>, %arg7: memref<128x128xf32, #tpu.memory_space<vmem>>) attributes {dimension_semantics = [#tpu.dimension_semantics<parallel>, #tpu.dimension_semantics<parallel>], iteration_bounds = array<i64: 3, 2>, scalar_prefetch = 0 : i64, scratch_operands = 0 : i64, tpu.core_type = #tpu.core_type<tc>, window_params = [{transform_indices = @transform_0, window_bounds = array<i64: 1, 1>}, {transform_indices = @transform_1, window_bounds = array<i64: 16, 128>}, {transform_indices = @transform_2, window_bounds = array<i64: 16, 128>}, {transform_indices = @transform_3, window_bounds = array<i64: 128, 1>}, {transform_indices = @transform_4, window_bounds = array<i64: 1, 128>}, {transform_indices = @transform_5, window_bounds = array<i64: 128, 128>}]} {
    %c0 = arith.constant 0 : index
    %c0_0 = arith.constant 0 : index
    %0 = memref.load %arg2[%c0, %c0_0] : memref<1x1xf32, #tpu.memory_space<smem>>
    %c0_1 = arith.constant 0 : index
    %c0_2 = arith.constant 0 : index
    %1 = vector.load %arg3[%c0_1, %c0_2] : memref<16x128xf32, #tpu.memory_space<vmem>>, vector<16x128xf32>
    %c0_3 = arith.constant 0 : index
    %c0_4 = arith.constant 0 : index
    %2 = vector.load %arg4[%c0_3, %c0_4] : memref<16x128xf32, #tpu.memory_space<vmem>>, vector<16x128xf32>
    %cst = arith.constant dense<0.000000e+00> : vector<128x128xf32>
    %3 = tpu.matmul %1, %2, %cst {dimension_numbers = #tpu.dot_dimension_numbers<[0], [0], [1], [1], [0, 1, 1, 1], [], []>} : vector<16x128xf32>, vector<16x128xf32>, vector<128x128xf32> -> vector<128x128xf32>
    %c0_5 = arith.constant 0 : index
    %c0_6 = arith.constant 0 : index
    %4 = vector.load %arg5[%c0_5, %c0_6] : memref<128x1xf32, #tpu.memory_space<vmem>>, vector<128x1xf32>
    %c0_7 = arith.constant 0 : index
    %c0_8 = arith.constant 0 : index
    %5 = vector.load %arg6[%c0_7, %c0_8] : memref<1x128xf32, #tpu.memory_space<vmem>>, vector<1x128xf32>
    %6 = vector.broadcast %4 : vector<128x1xf32> to vector<128x128xf32>
    %7 = vector.broadcast %5 : vector<1x128xf32> to vector<128x128xf32>
    %8 = arith.addf %6, %7 : vector<128x128xf32>
    %cst_9 = arith.constant 2.000000e+00 : f32
    %9 = vector.broadcast %cst_9 : f32 to vector<128x128xf32>
    %10 = arith.mulf %9, %3 : vector<128x128xf32>
    %11 = arith.subf %8, %10 : vector<128x128xf32>
    %cst_10 = arith.constant 0.000000e+00 : f32
    %12 = vector.broadcast %cst_10 : f32 to vector<128x128xf32>
    %13 = arith.maximumf %11, %12 : vector<128x128xf32>
    %14 = math.sqrt %13 : vector<128x128xf32>
    %15 = vector.broadcast %0 : f32 to vector<128x128xf32>
    %16 = arith.subf %15, %14 : vector<128x128xf32>
    %cst_11 = arith.constant 0.000000e+00 : f32
    %17 = vector.broadcast %cst_11 : f32 to vector<128x128xf32>
    %18 = arith.maximumf %16, %17 : vector<128x128xf32>
    %c0_12 = arith.constant 0 : index
    %c0_13 = arith.constant 0 : index
    %19 = vector.load %arg7[%c0_12, %c0_13] : memref<128x128xf32, #tpu.memory_space<vmem>>, vector<128x128xf32>
    tpu.vector_store %arg7[%c0_12, %c0_13], %18 {strides = array<i32>} : memref<128x128xf32, #tpu.memory_space<vmem>>, vector<128x128xf32>,
    return
  }
  func.func @transform_0(%arg0: i32, %arg1: i32) -> (i32, i32) {
    %c0_i32 = arith.constant 0 : i32
    %c0_i32_0 = arith.constant 0 : i32
    %c0_i32_1 = arith.constant 0 : i32
    return %c0_i32, %c0_i32_0 : i32, i32
  }
  func.func @transform_1(%arg0: i32, %arg1: i32) -> (i32, i32) {
    %c0_i32 = arith.constant 0 : i32
    %c0_i32_0 = arith.constant 0 : i32
    return %c0_i32, %arg0 : i32, i32
  }
  func.func @transform_2(%arg0: i32, %arg1: i32) -> (i32, i32) {
    %c0_i32 = arith.constant 0 : i32
    %c0_i32_0 = arith.constant 0 : i32
    return %c0_i32, %arg1 : i32, i32
  }
  func.func @transform_3(%arg0: i32, %arg1: i32) -> (i32, i32) {
    %c0_i32 = arith.constant 0 : i32
    %c0_i32_0 = arith.constant 0 : i32
    return %arg0, %c0_i32 : i32, i32
  }
  func.func @transform_4(%arg0: i32, %arg1: i32) -> (i32, i32) {
    %c0_i32 = arith.constant 0 : i32
    %c0_i32_0 = arith.constant 0 : i32
    return %c0_i32, %arg1 : i32, i32
  }
  func.func @transform_5(%arg0: i32, %arg1: i32) -> (i32, i32) {
    %c0_i32 = arith.constant 0 : i32
    return %arg0, %arg1 : i32, i32
  }
}

</mosaic_0001>

<bundles_post_ra>
// kernel: tpu_custom_call.1
= control target key start
LH: loop header
LB: loop body
LE: loop exit
PB: predicated region body
PF: predicated region fallthrough
CT: control target
= control target key end

     0   :  { %s1750_s0 = inlined_call_operand.<no memory space> [shape: f32[1,1], index: 0, kind: input, shape index: {}]   ;;  %s1751_s1 = inlined_call_operand.vmem [shape: f32[16,384], index: 1, kind: input, shape index: {}]   ;;  %s1752_s2 = inlined_call_operand.vmem [shape: f32[16,256], index: 2, kind: input, shape index: {}]   ;;  %s1753_s3 = inlined_call_operand.vmem [shape: f32[384,1], index: 3, kind: input, shape index: {}]   ;;  %s1754_s4 = inlined_call_operand.vmem [shape: f32[1,256], index: 4, kind: input, shape index: {}]   ;;  %s1755_s5 = inlined_call_operand.hbm [shape: f32[384,256], index: 5, kind: output, shape index: {}]  }
   0x1   :  { %10 = sst [smem:[#allocation2]] %s1750_s0 }
   0x2   :  { %11 = vsyncpa [#allocation6], 0 }
   0x3   :  { %13 = vsyncpa [#allocation6 + $0x1], 0  ;;  %s1419_s20 = smov 0   ;;  %s1421_s21 = smov 0  }
   0x4   :  { %s1423_s22 = smov 0   ;;  %s1425_s23 = smov 0  }
   0x5   :  { %s1427_s24 = smov 0   ;;  %s1429_s25 = smov 0  }
   0x6   :  { %s1431_s26 = smov 0   ;;  %s1433_s27 = smov 0  }
   0x7   :  { %s1435_s28 = smov 0   ;;  %s1437_s0 = smov 0  }
   0x8   :  { %s1439_s29 = smov 0   ;;  %s1441_s30 = smov 0  }
   0x9 LB: > { %1760 = sst [smem:[#allocation8_spill]] %s1360_s26  ;;  %s1067_s6 = sadd.s32 4294967295, %s1380_s30   ;;  %s1380_s30 = sphi %s1441_s30, %s19_s30   ;;  %s1376_s29 = sphi %s1439_s29, %s1775_s29   ;;  %s1372_s0 = sphi %s1437_s0, %s1782_s0   ;;  %s1368_s28 = sphi %s1435_s28, %s1773_s28   ;;  %s1364_s27 = sphi %s1433_s27, %s1781_s27   ;;  %s1360_s26 = sphi %s1431_s26, %s1772_s26   ;;  %s1356_s25 = sphi %s1429_s25, %s1771_s25   ;;  %s1352_s24 = sphi %s1427_s24, %s1780_s24   ;;  %s1348_s23 = sphi %s1425_s23, %s1779_s23   ;;  %s1344_s22 = sphi %s1423_s22, %s1778_s22   ;;  %s1340_s21 = sphi %s1421_s21, %s1777_s21   ;;  %s1336_s20 = sphi %s1419_s20, %s1776_s20  }
   0xa   : > { %1761 = sst [smem:[#allocation9_spill]] %s1376_s29  ;;  %s1068_s7 = sadd.s32 4294967294, %s1380_s30  }
   0xb   : > { %s28_s8 = sadd.s32 1, %s1372_s0  ;;  %s31_s9 = sadd.s32 1, %s1376_s29 }
   0xc   : > { %p29_p0 = scmp.ge.s32.totalorder %s28_s8, 2  ;;  %s59_s10 = sadd.s32 1, %s1360_s26 }
   0xd   : > { %p66_p1 = scmp.ne.s32.totalorder %s1360_s26, %s1356_s25  ;;  %p67_p2 = scmp.eq.s32.totalorder %s1380_s30, 0 }
   0xe   : > { %s1784_s8 = smov (%p29_p0, %s28_s8), 0  ;;  %s1786_s9 = smov (!%p29_p0, %s31_s9), %s1376_s29 }
   0xf   : > { %1762 = sst [smem:[#allocation10_spill]] %s1784_s8  ;;  %p1490_p3 = por %p67_p2, %p66_p1 }
  0x10   : > { %s82_s12 = ssub.s32 %s1372_s0, %s1784_s8  ;;  %p33_p4 = scmp.ge.s32.totalorder %s1786_s9, 3 }
  0x11   : > { %p83_p5 = scmp.eq.s32.totalorder %s82_s12, 0  ;;  %s85_s13 = sadd.s32 1, %s1352_s24 }
  0x12   : > { %p92_p6 = scmp.ne.s32.totalorder %s1352_s24, %s1348_s23  ;;  %s1788_s9 = smov (%p33_p4, %s1786_s9), 0 }
  0x13   : > { %1764 = sst [smem:[#allocation11_spill]] %s1788_s9  ;;  %s56_s15 = ssub.s32 %s1376_s29, %s1788_s9 }
  0x14   : > { %s1502_s14 = scalar_select %p83_p5, %s1352_s24, %s85_s13  }
  0x15   : > { %p1506_p7 = por %p92_p6, %p67_p2  ;;  %p57_p8 = scmp.eq.s32.totalorder %s56_s15, 0 }
  0x16   : > { %1765 = sst [smem:[#allocation12_spill]] %s1502_s14  ;;  %s162_s17 = sor.u32 %s82_s12, %s56_s15 }
  0x17   : > { %p163_p9 = scmp.eq.s32.totalorder %s162_s17, 0  ;;  %s165_s18 = sadd.s32 1, %s1344_s22 }
  0x18   : > { %s1512_s19 = scalar_select %p57_p8, %s1360_s26, %s59_s10  }
  0x19   : > { %s1515_s8 = scalar_select %p163_p9, %s1344_s22, %s165_s18  }
  0x1a   : > { %1767 = sst [smem:[#allocation13_spill]] %s1512_s19  ;;  %p175_p10 = scmp.ne.s32.totalorder %s1344_s22, %s1340_s21 }
  0x1b   : > { %p176_p11 = scmp.eq.s32.totalorder %s1067_s6, 5  ;;  %p181_p12 = scmp.ne.s32.totalorder %s1340_s21, %s1336_s20 }
  0x1c   : > { %p182_p13 = scmp.eq.s32.totalorder %s1068_s7, 5  ;;  %p1070_p2 = scmp.ge.s32.totalorder %s1380_s30, 6 }
  0x1d   : > { %p1521_p0 = por %p176_p11, %p175_p10 }
  0x1e   : > { %p1525_p1 = por %p182_p13, %p181_p12  ;;  %201 = sbr.rel (%p1070_p2) target bundleno = 47 (0x2f), region = 20 }
  0x23   : > { %204 = sbr.rel (!%p1490_p3) target bundleno = 41 (0x29), region = 24  ;;  %s206_s10 = sand.u32 (%p1490_p3), 1, %s1360_s26  }
  0x24   : > { %s1072_s6 = sshll.u32 (%p1490_p3), %s1376_s29, 3  ;;  %s1071_s12 = sshll.u32 (%p1490_p3), %s206_s10, 4 }
  0x25   : > { %s210_s17 = scalar_lea.vmem (%p1490_p3), %s1751_s1, %s1072_s6  ;;  %s208_s18 = scalar_lea.vmem (%p1490_p3), [#allocation3], %s1071_s12 }
  0x26   : > { %v241_v0 = vld [vmem:[%s210_s17] sm:$0xff] (%p1490_p3)  ;;  %v243_v1 = vld [vmem:[%s210_s17 + $0x18] sm:$0xff] (%p1490_p3) }
  0x27   : > { %242 = vst [vmem:[%s208_s18] sm:$0xff] (%p1490_p3), %v241_v0 }
  0x28   : > { %244 = vst [vmem:[%s208_s18 + $0x8] sm:$0xff] %v243_v1 }
  0x29 PF: > { %250 = sbr.rel (!%p1506_p7) target bundleno = 47 (0x2f), region = 62  ;;  %s252_s11 = sand.u32 (%p1506_p7), 1, %s1352_s24  }
  0x2a   : > { %s1074_s19 = sshll.u32 (%p1506_p7), %s1372_s0, 3  ;;  %s1073_s26 = sshll.u32 (%p1506_p7), %s252_s11, 4 }
  0x2b   : > { %s256_s14 = scalar_lea.vmem (%p1506_p7), %s1752_s2, %s1074_s19  ;;  %s254_s6 = scalar_lea.vmem (%p1506_p7), [#allocation4], %s1073_s26 }
  0x2c   : > { %v287_v2 = vld [vmem:[%s256_s14] sm:$0xff] (%p1506_p7)  ;;  %v289_v3 = vld [vmem:[%s256_s14 + $0x10] sm:$0xff] (%p1506_p7) }
  0x2d   : > { %288 = vst [vmem:[%s254_s6] sm:$0xff] (%p1506_p7), %v287_v2 }
  0x2e   : > { %290 = vst [vmem:[%s254_s6 + $0x8] sm:$0xff] %v289_v3 }
  0x2f PF: > { %p1075_p3 = scmp.ge.s32.totalorder %s1380_s30, 1  ;;  %p310_p4 = scmp.lt.s32.totalorder %s1380_s30, 7 }
  0x31   : > { %p311_p5 = pnand %p1075_p3, %p310_p4 }
  0x32   : > { %s317_s16 = sand.u32 (!%p311_p5), 1, %s1356_s25   ;;  %s324_s12 = sand.u32 (!%p311_p5), 1, %s1348_s23  }
  0x33   : > { %314 = sbr.rel (%p311_p5) target bundleno = 510 (0x1fe), region = 108  ;;  %s1076_s7 = sshll.u32 (!%p311_p5), %s317_s16, 4 }
  0x34   : > { %s1077_s29 = sshll.u32 (!%p311_p5), %s324_s12, 4  ;;  %s319_s19 = scalar_lea.vmem (!%p311_p5), [#allocation3], %s1076_s7 }
  0x35   : > { %s326_s26 = scalar_lea.vmem (!%p311_p5), [#allocation4], %s1077_s29  ;;  %s1079_s23 = sshll.u32 (!%p311_p5), %s1368_s28, 4 }
  0x36   : > { %p364_p6 = scmp.lt.s32.totalorder (!%p311_p5), %s1079_s23, 47  ;;  %p369_p7 = scmp.lt.s32.totalorder (!%p311_p5), %s1364_s27, 1 }
  0x37   : > { %s373_s7 = sld [smem:[#allocation2]] (!%p311_p5)  ;;  %s360_s29 = sand.u32 (!%p311_p5), 1, %s1340_s21  }
  0x38   : > { %v374_v4 = vld [vmem:[%s319_s19] sm:$0xff]  ;;  %v377_v5 = vld [vmem:[%s326_s26 + $0x8] sm:$0xff]  ;;  %s1790_s23 = smov (!%p364_p6, %s1079_s23), 47  ;;  %v1382_v9 = vmov 0   ;;  %vm410_vm0 = vcmask 130048   ;;  %s930_s11 = scalar_lea.sflag [#allocation6], %s360_s29 }
  0x39   : > { %378 = vxpose.xlu0.b32.start [1/2] (short) %v374_v4, 128  ;;  %473 = vmatpush.msra.mxu0 %v377_v5  ;;  %v376_v6 = vld [vmem:[%s326_s26] sm:$0xff]  ;;  %v375_v7 = vld [vmem:[%s319_s19 + $0x8] sm:$0xff]  ;;  %s1080_s25 = sshll.u32 %s1790_s23, 3  ;;  %s1078_s19 = sshll.u32 %s360_s29, 7 }
  0x3a   : > { %1104 = vmatpush.msra.mxu1 %v377_v5  ;;  %1105 = vmatpush.msra.mxu2 %v377_v5  ;;  %s1552_s17 = scalar_lea.vmem %s1753_s3, %s1080_s25  ;;  %s1611_s26 = scalar_lea.vmem [#allocation5], %s1078_s19 }
  0x3b   : > { %474 = vmatpush.msra.mxu0 %v376_v6  ;;  %1106 = vmatpush.msra.mxu3 %v377_v5  ;;  %v524_v8 = vld [vmem:[%s1552_s17] sm:$0xff]  ;;  %v525_v10 = vld [vmem:[%s1552_s17 + $0x8] sm:$0xff]  ;;  %s1558_s18 = scalar_select %p369_p7, %s1364_s27, 1  ;;  %v531_v15 = vld [vmem:[%s1552_s17 + $0x38] sm:$0xff] }
  0x3c   : > { %1107 = vmatpush.msra.mxu1 %v376_v6  ;;  %1108 = vmatpush.msra.mxu2 %v376_v6  ;;  %v529_v13 = vld [vmem:[%s1552_s17 + $0x28] sm:$0xff]  ;;  %v526_v16 = vld [vmem:[%s1552_s17 + $0x10] sm:$0xff]  ;;  %v527_v19 = vld [vmem:[%s1552_s17 + $0x18] sm:$0xff]  ;;  %s1103_s23 = sshll.u32 %s1368_s28, 5 }
  0x3d   : > { %1109 = vmatpush.msra.mxu3 %v376_v6  ;;  %1218 = vset.pattern.permute.xlu1 %v1382_v9  ;;  %s371_s6 = scalar_lea.vmem %s1754_s4, %s1558_s18  ;;  %v533_v18 = vld [vmem:[%s1552_s17 + $0x48] sm:$0xff]  ;;  %v535_v21 = vld [vmem:[%s1552_s17 + $0x58] sm:$0xff]  ;;  %v530_v25 = vld [vmem:[%s1552_s17 + $0x30] sm:$0xff]  ;;  %s941_s25 = sadd.s32 %s1364_s27, %s1103_s23 }
  0x3e   : > { %1219 = vset.pattern.permute.xlu2 %v1382_v9  ;;  %543 = vperm.xlu1 %1218, %v524_v8   ;;  %v537_v23 = vld [vmem:[%s1552_s17 + $0x68] sm:$0xff]  ;;  %v539_v26 = vld [vmem:[%s1552_s17 + $0x78] sm:$0xff]  ;;  %v532_v28 = vld [vmem:[%s1552_s17 + $0x40] sm:$0xff]  ;;  %s1100_s14 = sshll.u32 %s941_s25, 3  ;;  %s944_s27 = sshll.u32 %s1611_s26, 4  ;;  %s945_s27 = int_to_ptr.vmem [resolvable:$true] %s944_s27 }
  0x3f   : > { %553 = vperm.xlu2 %1219, %v526_v16   ;;  %v528_v29 = vld [vmem:[%s1552_s17 + $0x20] sm:$0xff]  ;;  %v534_v31 = vld [vmem:[%s1552_s17 + $0x50] sm:$0xff] }
  0x40   : > { %v536_v33 = vld [vmem:[%s1552_s17 + $0x60] sm:$0xff]  ;;  %v538_v35 = vld [vmem:[%s1552_s17 + $0x70] sm:$0xff]  ;;  %s943_s17 = scalar_lea.hbm %s1755_s5, %s1100_s14 }
  0x41   : > { %379 = vxpose.xlu0.b32.end [2/2] (short) %v375_v7, 128  ;;  %v1599_v42 = vld [vmem:[%s371_s6] ss:$0 sm:$0xff]  ;;  %s946_s18 = sshll.u32 %s943_s17, 4  ;;  %s947_s18 = int_to_ptr.hbm [resolvable:$true] %s946_s18 }
  0x42   : > { %s1268_s10 = sshra.s32 %s947_s18, 4  ;;  %s1269_s10 = int_to_ptr.hbm [resolvable:$true] %s1268_s10 }
  0x43   : > { %s1270_s6 = scalar_lea.hbm %s1269_s10, 128  ;;  %p1275_p11 = scmp.lt.s32.totalorder %s1269_s10, %s1755_s5 }
  0x44   : > { %p1271_p8 = scmp.ne.s32.totalorder %s1269_s10, %s1270_s6 }
  0x46   : > { %548 = vperm.xlu1 %1218, %v525_v10   ;;  %v1606_v10 = vstv %s373_s7  ;;  %p1272_p9 = pnand %p1271_p8, %p1521_p0  ;;  %s1274_s7 = scalar_lea.hbm %s1755_s5, 768 }
  0x47   : > { %558 = vperm.xlu2 %1219, %v527_v19   ;;  %p1276_p12 = scmp.lt.s32.totalorder %s1274_s7, %s1270_s6 }
  0x48   : > { %p1273_p10 = pneg %p1272_p9 }
  0x49   : > { %p1277_p13 = por %p1276_p12, %p1275_p11 }
  0x4b   : > { %p1278_p2 = pnand %p1277_p13, %p1273_p10 }
  0x4e   : > { %568 = vperm.xlu1 %1218, %v529_v13  }
  0x4f   : > { %573 = vperm.xlu2 %1219, %v530_v25  }
  0x56   : > { %578 = vperm.xlu1 %1218, %v531_v15  }
  0x57   : > { %583 = vperm.xlu2 %1219, %v532_v28  }
  0x5e   : > { %588 = vperm.xlu1 %1218, %v533_v18  }
  0x5f   : > { %593 = vperm.xlu2 %1219, %v534_v31  }
  0x66   : > { %598 = vperm.xlu1 %1218, %v535_v21  }
  0x67   : > { %603 = vperm.xlu2 %1219, %v536_v33  }
  0x6e   : > { %608 = vperm.xlu1 %1218, %v537_v23  }
  0x6f   : > { %613 = vperm.xlu2 %1219, %v538_v35  }
  0x76   : > { %618 = vperm.xlu1 %1218, %v539_v26  }
  0x99   : > { %v554_v52 = vpop.permute.xlu2 %553 }
  0x9a   : > { %v626_v57 = vadd.f32 %v1599_v42, %v554_v52 }
  0xa1   : > { %v559_v0 = vpop.permute.xlu2 %558 }
  0xa2   : > { %v627_v5 = vadd.f32 %v1599_v42, %v559_v0 }
  0xa8   : > { %1220 = vset.pattern.permute.xlu0 %v1382_v9 }
  0xb0   : > { %v544_v41 = vpop.permute.xlu1 %543 }
  0xb1   : > { %v624_v43 = vadd.f32 %v1599_v42, %v544_v41 }
  0xb8   : > { %v549_v47 = vpop.permute.xlu1 %548 }
  0xb9   : > { %v625_v49 = vadd.f32 %v1599_v42, %v549_v47 }
  0xdd   : > { %v394_v11 = vpop.trf.xlu0 }
  0xde   : > { %1081 = vmatmul.msk.f32.vlgmr.msra.gmra.mxu0 %vm410_vm0, %v394_v11 }
  0xe5   : > { %v395_v12 = vpop.trf.xlu0 }
  0xe6   : > { %1082 = vmatmul.msk.f32.gmra.mxu0 %vm410_vm0, %v395_v12 }
  0xed   : > { %v396_v14 = vpop.trf.xlu0 }
  0xee   : > { %1083 = vmatmul.msk.f32.gmra.mxu0 %vm410_vm0, %v396_v14 }
  0xf5   : > { %v397_v17 = vpop.trf.xlu0 }
  0xf6   : > { %1084 = vmatmul.msk.f32.gmra.mxu0 %vm410_vm0, %v397_v17 }
  0xfd   : > { %v398_v20 = vpop.trf.xlu0 }
  0xfe   : > { %1085 = vmatmul.msk.f32.vlgmr.msra.gmra.mxu1 %vm410_vm0, %v398_v20 }
 0x105   : > { %v399_v22 = vpop.trf.xlu0 }
 0x106   : > { %1086 = vmatmul.msk.f32.gmra.mxu1 %vm410_vm0, %v399_v22 }
 0x10d   : > { %v400_v24 = vpop.trf.xlu0 }
 0x10e   : > { %1087 = vmatmul.msk.f32.gmra.mxu1 %vm410_vm0, %v400_v24 }
 0x115   : > { %v401_v27 = vpop.trf.xlu0 }
 0x116   : > { %1088 = vmatmul.msk.f32.gmra.mxu1 %vm410_vm0, %v401_v27 }
 0x11d   : > { %v402_v30 = vpop.trf.xlu0 }
 0x11e   : > { %1089 = vmatmul.msk.f32.vlgmr.msra.gmra.mxu2 %vm410_vm0, %v402_v30 }
 0x11f   : > { %563 = vperm.xlu0 %1220, %v528_v29  }
 0x125   : > { %v403_v32 = vpop.trf.xlu0 }
 0x126   : > { %1090 = vmatmul.msk.f32.gmra.mxu2 %vm410_vm0, %v403_v32 }
 0x12d   : > { %v404_v34 = vpop.trf.xlu0 }
 0x12e   : > { %1091 = vmatmul.msk.f32.gmra.mxu2 %vm410_vm0, %v404_v34 }
 0x135   : > { %v405_v36 = vpop.trf.xlu0 }
 0x136   : > { %1092 = vmatmul.msk.f32.gmra.mxu2 %vm410_vm0, %v405_v36  ;;  %v569_v36 = vpop.permute.xlu1 %568 }
 0x13d   : > { %v406_v37 = vpop.trf.xlu0 }
 0x13e   : > { %1093 = vmatmul.msk.f32.vlgmr.msra.gmra.mxu3 %vm410_vm0, %v406_v37  ;;  %v629_v37 = vadd.f32 %v1599_v42, %v569_v36 }
 0x145   : > { %v407_v38 = vpop.trf.xlu0 }
 0x146   : > { %1094 = vmatmul.msk.f32.gmra.mxu3 %vm410_vm0, %v407_v38 }
 0x14d   : > { %v408_v39 = vpop.trf.xlu0 }
 0x14e   : > { %1095 = vmatmul.msk.f32.gmra.mxu3 %vm410_vm0, %v408_v39 }
 0x155   : > { %v409_v40 = vpop.trf.xlu0 }
 0x156   : > { %1096 = vmatmul.msk.f32.gmra.mxu3 %vm410_vm0, %v409_v40 }
 0x15b   : > { %v476_v44 = vpop.f32.mrf.mxu0 }
 0x15c   : > { %v640_v45 = vmul.f32 2.0, %v476_v44 }
 0x15e   : > { %v656_v46 = vsub.f32 %v624_v43, %v640_v45 }
 0x160   : > { %v672_v48 = vmax.f32 %v656_v46, 0.0 }
 0x162   : > { %1222 = vrsqrt.f32 %v672_v48  ;;  %vm695_vm1 = vcmp.eq.f32.partialorder %v672_v48, inf  ;;  %v698_v9 = vand.u32 2147483648, %v672_v48  ;;  %vm697_vm2 = vcmp.eq.f32.partialorder %v672_v48, 0.0 }
 0x163   : > { %v479_v50 = vpop.f32.mrf.mxu0 }
 0x164   : > { %v641_v51 = vmul.f32 2.0, %v479_v50 }
 0x166   : > { %v657_v53 = vsub.f32 %v625_v49, %v641_v51 }
 0x168   : > { %v1223_v54 = vpop.eup %1222  ;;  %v673_v55 = vmax.f32 %v657_v53, 0.0  ;;  %v574_v53 = vpop.permute.xlu2 %573 }
 0x169   : > { %v689_v56 = vmul.f32 %v1223_v54, %v672_v48 }
 0x16a   : > { %1224 = vrsqrt.f32 %v673_v55  ;;  %vm707_vm3 = vcmp.eq.f32.partialorder %v673_v55, inf  ;;  %v710_v26 = vand.u32 2147483648, %v673_v55  ;;  %vm709_vm4 = vcmp.eq.f32.partialorder %v673_v55, 0.0 }
 0x16b   : > { %v690_v58 = vmul.f32 %v1223_v54, %v689_v56  ;;  %v482_v59 = vpop.f32.mrf.mxu0 }
 0x16c   : > { %v642_v60 = vmul.f32 2.0, %v482_v59 }
 0x16d   : > { %v691_v61 = vmul.f32 0.5, %v690_v58 }
 0x16e   : > { %v658_v62 = vsub.f32 %v626_v57, %v642_v60 }
 0x16f   : > { %v692_v63 = vsub.f32 1.5, %v691_v61 }
 0x170   : > { %v1225_v1 = vpop.eup %1224  ;;  %v674_v2 = vmax.f32 %v658_v62, 0.0 }
 0x171   : > { %v693_v3 = vmul.f32 %v1223_v54, %v692_v63  ;;  %v701_v4 = vmul.f32 %v1225_v1, %v673_v55  ;;  %v630_v54 = vadd.f32 %v1599_v42, %v574_v53 }
 0x172   : > { %1226 = vrsqrt.f32 %v674_v2  ;;  %vm719_vm5 = vcmp.eq.f32.partialorder %v674_v2, inf  ;;  %v722_v41 = vand.u32 2147483648, %v674_v2  ;;  %vm721_vm6 = vcmp.eq.f32.partialorder %v674_v2, 0.0 }
 0x173   : > { %v694_v6 = vmul.f32 %v693_v3, %v672_v48  ;;  %v702_v7 = vmul.f32 %v1225_v1, %v701_v4  ;;  %v485_v8 = vpop.f32.mrf.mxu0 }
 0x174   : > { %v643_v11 = vmul.f32 2.0, %v485_v8 }
 0x175   : > { %v696_v12 = vsel %vm695_vm1, %v672_v48, %v694_v6  ;;  %v703_v13 = vmul.f32 0.5, %v702_v7 }
 0x176   : > { %v699_v14 = vsel %vm697_vm2, %v698_v9, %v696_v12  ;;  %v659_v15 = vsub.f32 %v627_v5, %v643_v11 }
 0x177   : > { %v881_v16 = vsub.f32 %v1606_v10, %v699_v14  ;;  %v704_v17 = vsub.f32 1.5, %v703_v13 }
 0x178   : > { %v1227_v18 = vpop.eup %1226  ;;  %v675_v19 = vmax.f32 %v659_v15, 0.0 }
 0x179   : > { %v897_v20 = vmax.f32 %v881_v16, 0.0  ;;  %v705_v21 = vmul.f32 %v1225_v1, %v704_v17  ;;  %v713_v22 = vmul.f32 %v1227_v18, %v674_v2 }
 0x17a   : > { %1228 = vrsqrt.f32 %v675_v19  ;;  %vm731_vm7 = vcmp.eq.f32.partialorder %v675_v19, inf  ;;  %v734_v57 = vand.u32 2147483648, %v675_v19  ;;  %vm733_vm8 = vcmp.eq.f32.partialorder %v675_v19, 0.0 }
 0x17b   : > { %913 = vst [vmem:[%s1611_s26] sm:$0xff] %v897_v20  ;;  %v706_v23 = vmul.f32 %v705_v21, %v673_v55  ;;  %v714_v24 = vmul.f32 %v1227_v18, %v713_v22  ;;  %v488_v25 = vpop.f32.mrf.mxu1 }
 0x17c   : > { %v644_v6 = vmul.f32 2.0, %v488_v25 }
 0x17d   : > { %v708_v27 = vsel %vm707_vm3, %v673_v55, %v706_v23  ;;  %v715_v28 = vmul.f32 0.5, %v714_v24 }
 0x17e   : > { %v711_v29 = vsel %vm709_vm4, %v710_v26, %v708_v27 }
 0x17f   : > { %v882_v30 = vsub.f32 %v1606_v10, %v711_v29  ;;  %v716_v31 = vsub.f32 1.5, %v715_v28 }
 0x180   : > { %v1229_v32 = vpop.eup %1228 }
 0x181   : > { %v898_v33 = vmax.f32 %v882_v30, 0.0  ;;  %v717_v34 = vmul.f32 %v1227_v18, %v716_v31  ;;  %v725_v35 = vmul.f32 %v1229_v32, %v675_v19  ;;  %v584_v30 = vpop.permute.xlu2 %583 }
 0x183   : > { %914 = vst [vmem:[%s1611_s26 + $0x8] sm:$0xff] %v898_v33  ;;  %v718_v38 = vmul.f32 %v717_v34, %v674_v2  ;;  %v726_v39 = vmul.f32 %v1229_v32, %v725_v35  ;;  %v491_v40 = vpop.f32.mrf.mxu1 }
 0x184   : > { %v645_v43 = vmul.f32 2.0, %v491_v40 }
 0x185   : > { %v720_v44 = vsel %vm719_vm5, %v674_v2, %v718_v38  ;;  %v727_v45 = vmul.f32 0.5, %v726_v39  ;;  %v579_v2 = vpop.permute.xlu1 %578 }
 0x186   : > { %v723_v46 = vsel %vm721_vm6, %v722_v41, %v720_v44  ;;  %v661_v47 = vsub.f32 %v629_v37, %v645_v43  ;;  %v631_v5 = vadd.f32 %v1599_v42, %v579_v2 }
 0x187   : > { %v883_v48 = vsub.f32 %v1606_v10, %v723_v46  ;;  %v728_v49 = vsub.f32 1.5, %v727_v45 }
 0x188   : > { %v677_v50 = vmax.f32 %v661_v47, 0.0 }
 0x189   : > { %v899_v51 = vmax.f32 %v883_v48, 0.0  ;;  %v729_v52 = vmul.f32 %v1229_v32, %v728_v49  ;;  %v632_v32 = vadd.f32 %v1599_v42, %v584_v30 }
 0x18a   : > { %1230 = vrsqrt.f32 %v677_v50  ;;  %vm755_vm9 = vcmp.eq.f32.partialorder %v677_v50, inf  ;;  %v758_v23 = vand.u32 2147483648, %v677_v50  ;;  %vm757_vm10 = vcmp.eq.f32.partialorder %v677_v50, 0.0 }
 0x18b   : > { %915 = vst [vmem:[%s1611_s26 + $0x10] sm:$0xff] %v899_v51  ;;  %v730_v55 = vmul.f32 %v729_v52, %v675_v19  ;;  %v494_v56 = vpop.f32.mrf.mxu1 }
 0x18c   : > { %v646_v58 = vmul.f32 2.0, %v494_v56 }
 0x18d   : > { %v732_v59 = vsel %vm731_vm7, %v675_v19, %v730_v55 }
 0x18e   : > { %v735_v60 = vsel %vm733_vm8, %v734_v57, %v732_v59  ;;  %v662_v61 = vsub.f32 %v630_v54, %v646_v58  ;;  %v589_v54 = vpop.permute.xlu1 %588 }
 0x18f   : > { %v884_v62 = vsub.f32 %v1606_v10, %v735_v60  ;;  %v633_v58 = vadd.f32 %v1599_v42, %v589_v54 }
 0x190   : > { %v1231_v63 = vpop.eup %1230  ;;  %v678_v0 = vmax.f32 %v662_v61, 0.0 }
 0x191   : > { %v900_v1 = vmax.f32 %v884_v62, 0.0  ;;  %v749_v3 = vmul.f32 %v1231_v63, %v677_v50  ;;  %v564_v4 = vpop.permute.xlu0 %563 }
 0x192   : > { %1232 = vrsqrt.f32 %v678_v0  ;;  %v628_v8 = vadd.f32 %v1599_v42, %v564_v4  ;;  %vm767_vm11 = vcmp.eq.f32.partialorder %v678_v0, inf  ;;  %v770_v43 = vand.u32 2147483648, %v678_v0 }
 0x193   : > { %916 = vst [vmem:[%s1611_s26 + $0x18] sm:$0xff] %v900_v1  ;;  %v750_v7 = vmul.f32 %v1231_v63, %v749_v3  ;;  %v497_v9 = vpop.f32.mrf.mxu1  ;;  %vm769_vm12 = vcmp.eq.f32.partialorder %v678_v0, 0.0 }
 0x194   : > { %v647_v11 = vmul.f32 2.0, %v497_v9  ;;  %v660_v13 = vsub.f32 %v628_v8, %v644_v6 }
 0x195   : > { %v751_v12 = vmul.f32 0.5, %v750_v7 }
 0x196   : > { %v663_v14 = vsub.f32 %v631_v5, %v647_v11  ;;  %v1624_v16 = vmax.f32 %v660_v13, 0.0  ;;  %v594_v13 = vpop.permute.xlu2 %593 }
 0x197   : > { %v752_v15 = vsub.f32 1.5, %v751_v12 }
 0x198   : > { %v1233_v17 = vpop.eup %1232  ;;  %v1626_v18 = vmax.f32 %v663_v14, 0.0  ;;  %1234 = vrsqrt.f32 %v1624_v16  ;;  %vm743_vm13 = vcmp.eq.f32.partialorder %v1624_v16, inf  ;;  %vm745_vm14 = vcmp.eq.f32.partialorder %v1624_v16, 0.0 }
 0x199   : > { %v753_v19 = vmul.f32 %v1231_v63, %v752_v15  ;;  %v761_v20 = vmul.f32 %v1233_v17, %v678_v0  ;;  %v746_v61 = vand.u32 2147483648, %v1624_v16 }
 0x19a   : > { %1236 = vrsqrt.f32 %v1626_v18  ;;  %vm779_vm15 = vcmp.eq.f32.partialorder %v1626_v18, inf  ;;  %vm781_vm0 = vcmp.eq.f32.partialorder %v1626_v18, 0.0 }
 0x19b   : > { %v754_v21 = vmul.f32 %v753_v19, %v677_v50  ;;  %v762_v22 = vmul.f32 %v1233_v17, %v761_v20 }
 0x19d   : > { %v756_v24 = vsel %vm755_vm9, %v677_v50, %v754_v21  ;;  %v763_v25 = vmul.f32 0.5, %v762_v22 }
 0x19e   : > { %v759_v26 = vsel %vm757_vm10, %v758_v23, %v756_v24  ;;  %v1235_v27 = vpop.eup %1234 }
 0x19f   : > { %v886_v28 = vsub.f32 %v1606_v10, %v759_v26  ;;  %v764_v29 = vsub.f32 1.5, %v763_v25  ;;  %v737_v33 = vmul.f32 %v1235_v27, %v1624_v16  ;;  %v599_v25 = vpop.permute.xlu1 %598 }
 0x1a0   : > { %v1237_v31 = vpop.eup %1236 }
 0x1a1   : > { %v902_v34 = vmax.f32 %v886_v28, 0.0  ;;  %v765_v35 = vmul.f32 %v1233_v17, %v764_v29  ;;  %v773_v36 = vmul.f32 %v1237_v31, %v1626_v18  ;;  %v500_v37 = vpop.f32.mrf.mxu2  ;;  %v738_v38 = vmul.f32 %v1235_v27, %v737_v33 }
 0x1a2   : > { %v648_v39 = vmul.f32 2.0, %v500_v37  ;;  %v635_v29 = vadd.f32 %v1599_v42, %v599_v25 }
 0x1a3   : > { %918 = vst [vmem:[%s1611_s26 + $0x28] sm:$0xff] %v902_v34  ;;  %v766_v40 = vmul.f32 %v765_v35, %v678_v0  ;;  %v774_v41 = vmul.f32 %v1237_v31, %v773_v36  ;;  %v739_v44 = vmul.f32 0.5, %v738_v38 }
 0x1a4   : > { %v664_v45 = vsub.f32 %v632_v32, %v648_v39 }
 0x1a5   : > { %v768_v46 = vsel %vm767_vm11, %v678_v0, %v766_v40  ;;  %v775_v47 = vmul.f32 0.5, %v774_v41  ;;  %v740_v49 = vsub.f32 1.5, %v739_v44  ;;  %v782_v0 = vand.u32 2147483648, %v1626_v18  ;;  %v604_v44 = vpop.permute.xlu2 %603 }
 0x1a6   : > { %v771_v48 = vsel %vm769_vm12, %v770_v43, %v768_v46  ;;  %v680_v50 = vmax.f32 %v664_v45, 0.0 }
 0x1a7   : > { %v887_v51 = vsub.f32 %v1606_v10, %v771_v48  ;;  %v776_v52 = vsub.f32 1.5, %v775_v47  ;;  %v741_v53 = vmul.f32 %v1235_v27, %v740_v49  ;;  %v636_v48 = vadd.f32 %v1599_v42, %v604_v44 }
 0x1a8   : > { %1238 = vrsqrt.f32 %v680_v50  ;;  %vm791_vm1 = vcmp.eq.f32.partialorder %v680_v50, inf  ;;  %v794_v30 = vand.u32 2147483648, %v680_v50  ;;  %vm793_vm2 = vcmp.eq.f32.partialorder %v680_v50, 0.0 }
 0x1a9   : > { %v903_v55 = vmax.f32 %v887_v51, 0.0  ;;  %v777_v56 = vmul.f32 %v1237_v31, %v776_v52  ;;  %v503_v57 = vpop.f32.mrf.mxu2  ;;  %v742_v59 = vmul.f32 %v741_v53, %v1624_v16 }
 0x1aa   : > { %v649_v60 = vmul.f32 2.0, %v503_v57 }
 0x1ab   : > { %919 = vst [vmem:[%s1611_s26 + $0x30] sm:$0xff] %v903_v55  ;;  %v778_v62 = vmul.f32 %v777_v56, %v1626_v18  ;;  %v744_v63 = vsel %vm743_vm13, %v1624_v16, %v742_v59  ;;  %v634_v16 = vadd.f32 %v1599_v42, %v594_v13 }
 0x1ac   : > { %v665_v1 = vsub.f32 %v633_v58, %v649_v60  ;;  %v747_v2 = vsel %vm745_vm14, %v746_v61, %v744_v63 }
 0x1ad   : > { %v780_v3 = vsel %vm779_vm15, %v1626_v18, %v778_v62  ;;  %v885_v5 = vsub.f32 %v1606_v10, %v747_v2  ;;  %v609_v62 = vpop.permute.xlu1 %608 }
 0x1ae   : > { %v1239_v4 = vpop.eup %1238  ;;  %v783_v6 = vsel %vm781_vm0, %v782_v0, %v780_v3  ;;  %v681_v7 = vmax.f32 %v665_v1, 0.0  ;;  %v637_v2 = vadd.f32 %v1599_v42, %v609_v62 }
 0x1af   : > { %v888_v8 = vsub.f32 %v1606_v10, %v783_v6  ;;  %v785_v9 = vmul.f32 %v1239_v4, %v680_v50  ;;  %v901_v11 = vmax.f32 %v885_v5, 0.0 }
 0x1b0   : > { %1240 = vrsqrt.f32 %v681_v7  ;;  %vm803_vm3 = vcmp.eq.f32.partialorder %v681_v7, inf  ;;  %v806_v49 = vand.u32 2147483648, %v681_v7  ;;  %vm805_vm4 = vcmp.eq.f32.partialorder %v681_v7, 0.0 }
 0x1b1   : > { %v904_v12 = vmax.f32 %v888_v8, 0.0  ;;  %v786_v14 = vmul.f32 %v1239_v4, %v785_v9  ;;  %v506_v15 = vpop.f32.mrf.mxu2  ;;  %917 = vst [vmem:[%s1611_s26 + $0x20] sm:$0xff] %v901_v11 }
 0x1b2   : > { %v650_v17 = vmul.f32 2.0, %v506_v15 }
 0x1b3   : > { %920 = vst [vmem:[%s1611_s26 + $0x38] sm:$0xff] %v904_v12  ;;  %v787_v18 = vmul.f32 0.5, %v786_v14  ;;  %v614_v14 = vpop.permute.xlu2 %613 }
 0x1b4   : > { %v666_v19 = vsub.f32 %v634_v16, %v650_v17 }
 0x1b5   : > { %v788_v20 = vsub.f32 1.5, %v787_v18 }
 0x1b6   : > { %v1241_v21 = vpop.eup %1240  ;;  %v682_v22 = vmax.f32 %v666_v19, 0.0 }
 0x1b7   : > { %v789_v23 = vmul.f32 %v1239_v4, %v788_v20  ;;  %v797_v24 = vmul.f32 %v1241_v21, %v681_v7 }
 0x1b8   : > { %1242 = vrsqrt.f32 %v682_v22  ;;  %vm815_vm5 = vcmp.eq.f32.partialorder %v682_v22, inf  ;;  %v818_v3 = vand.u32 2147483648, %v682_v22  ;;  %vm817_vm6 = vcmp.eq.f32.partialorder %v682_v22, 0.0 }
 0x1b9   : > { %v790_v26 = vmul.f32 %v789_v23, %v680_v50  ;;  %v798_v27 = vmul.f32 %v1241_v21, %v797_v24  ;;  %v509_v28 = vpop.f32.mrf.mxu2 }
 0x1ba   : > { %v651_v31 = vmul.f32 2.0, %v509_v28 }
 0x1bb   : > { %v792_v32 = vsel %vm791_vm1, %v680_v50, %v790_v26  ;;  %v799_v33 = vmul.f32 0.5, %v798_v27 }
 0x1bc   : > { %v795_v34 = vsel %vm793_vm2, %v794_v30, %v792_v32  ;;  %v667_v35 = vsub.f32 %v635_v29, %v651_v31  ;;  %v619_v32 = vpop.permute.xlu1 %618 }
 0x1bd   : > { %v889_v36 = vsub.f32 %v1606_v10, %v795_v34  ;;  %v800_v37 = vsub.f32 1.5, %v799_v33 }
 0x1be   : > { %v1243_v38 = vpop.eup %1242  ;;  %v1655_v39 = vmax.f32 %v667_v35, 0.0 }
 0x1bf   : > { %v905_v40 = vmax.f32 %v889_v36, 0.0  ;;  %v801_v41 = vmul.f32 %v1241_v21, %v800_v37  ;;  %v809_v43 = vmul.f32 %v1243_v38, %v682_v22  ;;  %v638_v21 = vadd.f32 %v1599_v42, %v614_v14 }
 0x1c0   : > { %1244 = vrsqrt.f32 %v1655_v39  ;;  %vm827_vm7 = vcmp.eq.f32.partialorder %v1655_v39, inf  ;;  %vm829_vm8 = vcmp.eq.f32.partialorder %v1655_v39, 0.0 }
 0x1c1   : > { %921 = vst [vmem:[%s1611_s26 + $0x40] sm:$0xff] %v905_v40  ;;  %v802_v45 = vmul.f32 %v801_v41, %v681_v7  ;;  %v810_v46 = vmul.f32 %v1243_v38, %v809_v43  ;;  %v512_v47 = vpop.f32.mrf.mxu3 }
 0x1c2   : > { %v652_v50 = vmul.f32 2.0, %v512_v47 }
 0x1c3   : > { %v804_v51 = vsel %vm803_vm3, %v681_v7, %v802_v45  ;;  %v811_v52 = vmul.f32 0.5, %v810_v46 }
 0x1c4   : > { %v807_v53 = vsel %vm805_vm4, %v806_v49, %v804_v51  ;;  %v668_v54 = vsub.f32 %v636_v48, %v652_v50 }
 0x1c5   : > { %v890_v55 = vsub.f32 %v1606_v10, %v807_v53  ;;  %v812_v56 = vsub.f32 1.5, %v811_v52 }
 0x1c6   : > { %v1245_v57 = vpop.eup %1244  ;;  %v1661_v58 = vmax.f32 %v668_v54, 0.0 }
 0x1c7   : > { %v906_v59 = vmax.f32 %v890_v55, 0.0  ;;  %v813_v60 = vmul.f32 %v1243_v38, %v812_v56  ;;  %v821_v61 = vmul.f32 %v1245_v57, %v1655_v39 }
 0x1c8   : > { %1246 = vrsqrt.f32 %v1661_v58  ;;  %vm839_vm9 = vcmp.eq.f32.partialorder %v1661_v58, inf  ;;  %v842_v40 = vand.u32 2147483648, %v1661_v58  ;;  %vm841_vm10 = vcmp.eq.f32.partialorder %v1661_v58, 0.0 }
 0x1c9   : > { %922 = vst [vmem:[%s1611_s26 + $0x48] sm:$0xff] %v906_v59  ;;  %v814_v63 = vmul.f32 %v813_v60, %v682_v22  ;;  %v822_v0 = vmul.f32 %v1245_v57, %v821_v61  ;;  %v515_v1 = vpop.f32.mrf.mxu3 }
 0x1ca   : > { %v653_v4 = vmul.f32 2.0, %v515_v1 }
 0x1cb   : > { %v816_v5 = vsel %vm815_vm5, %v682_v22, %v814_v63  ;;  %v823_v6 = vmul.f32 0.5, %v822_v0  ;;  %v830_v22 = vand.u32 2147483648, %v1655_v39 }
 0x1cc   : > { %v819_v7 = vsel %vm817_vm6, %v818_v3, %v816_v5  ;;  %v669_v8 = vsub.f32 %v637_v2, %v653_v4 }
 0x1cd   : > { %v891_v9 = vsub.f32 %v1606_v10, %v819_v7  ;;  %v824_v11 = vsub.f32 1.5, %v823_v6 }
 0x1ce   : > { %v1247_v12 = vpop.eup %1246  ;;  %v685_v13 = vmax.f32 %v669_v8, 0.0 }
 0x1cf   : > { %v907_v15 = vmax.f32 %v891_v9, 0.0  ;;  %v825_v16 = vmul.f32 %v1245_v57, %v824_v11  ;;  %v833_v17 = vmul.f32 %v1247_v12, %v1661_v58 }
 0x1d0   : > { %1248 = vrsqrt.f32 %v685_v13  ;;  %vm851_vm11 = vcmp.eq.f32.partialorder %v685_v13, inf  ;;  %v854_v55 = vand.u32 2147483648, %v685_v13  ;;  %vm853_vm12 = vcmp.eq.f32.partialorder %v685_v13, 0.0 }
 0x1d1   : > { %923 = vst [vmem:[%s1611_s26 + $0x50] sm:$0xff] %v907_v15  ;;  %v826_v18 = vmul.f32 %v825_v16, %v1655_v39  ;;  %v834_v19 = vmul.f32 %v1247_v12, %v833_v17  ;;  %v518_v20 = vpop.f32.mrf.mxu3 }
 0x1d2   : > { %v654_v23 = vmul.f32 2.0, %v518_v20 }
 0x1d3   : > { %v828_v24 = vsel %vm827_vm7, %v1655_v39, %v826_v18  ;;  %v835_v25 = vmul.f32 0.5, %v834_v19  ;;  %v639_v39 = vadd.f32 %v1599_v42, %v619_v32 }
 0x1d4   : > { %v831_v26 = vsel %vm829_vm8, %v830_v22, %v828_v24  ;;  %v670_v27 = vsub.f32 %v638_v21, %v654_v23 }
 0x1d5   : > { %v892_v28 = vsub.f32 %v1606_v10, %v831_v26  ;;  %v836_v29 = vsub.f32 1.5, %v835_v25 }
 0x1d6   : > { %v1249_v30 = vpop.eup %1248  ;;  %v686_v31 = vmax.f32 %v670_v27, 0.0 }
 0x1d7   : > { %v908_v33 = vmax.f32 %v892_v28, 0.0  ;;  %v837_v34 = vmul.f32 %v1247_v12, %v836_v29  ;;  %v845_v35 = vmul.f32 %v1249_v30, %v685_v13 }
 0x1d8   : > { %1250 = vrsqrt.f32 %v686_v31  ;;  %vm863_vm13 = vcmp.eq.f32.partialorder %v686_v31, inf  ;;  %v866_v3 = vand.u32 2147483648, %v686_v31  ;;  %vm865_vm14 = vcmp.eq.f32.partialorder %v686_v31, 0.0 }
 0x1d9   : > { %924 = vst [vmem:[%s1611_s26 + $0x58] sm:$0xff] %v908_v33  ;;  %v838_v36 = vmul.f32 %v837_v34, %v1661_v58  ;;  %v846_v37 = vmul.f32 %v1249_v30, %v845_v35  ;;  %v521_v38 = vpop.f32.mrf.mxu3 }
 0x1da   : > { %v655_v41 = vmul.f32 2.0, %v521_v38 }
 0x1db   : > { %v840_v43 = vsel %vm839_vm9, %v1661_v58, %v838_v36  ;;  %v847_v44 = vmul.f32 0.5, %v846_v37 }
 0x1dc   : > { %v843_v45 = vsel %vm841_vm10, %v842_v40, %v840_v43  ;;  %v671_v46 = vsub.f32 %v639_v39, %v655_v41 }
 0x1dd   : > { %v893_v47 = vsub.f32 %v1606_v10, %v843_v45  ;;  %v848_v48 = vsub.f32 1.5, %v847_v44 }
 0x1de   : > { %v1251_v49 = vpop.eup %1250  ;;  %v687_v50 = vmax.f32 %v671_v46, 0.0 }
 0x1df   : > { %v909_v51 = vmax.f32 %v893_v47, 0.0  ;;  %v849_v42 = vmul.f32 %v1249_v30, %v848_v48  ;;  %v857_v52 = vmul.f32 %v1251_v49, %v686_v31 }
 0x1e0   : > { %1252 = vrsqrt.f32 %v687_v50  ;;  %vm875_vm15 = vcmp.eq.f32.partialorder %v687_v50, inf  ;;  %vm877_vm0 = vcmp.eq.f32.partialorder %v687_v50, 0.0 }
 0x1e1   : > { %925 = vst [vmem:[%s1611_s26 + $0x60] sm:$0xff] %v909_v51  ;;  %v850_v53 = vmul.f32 %v849_v42, %v685_v13  ;;  %v858_v54 = vmul.f32 %v1251_v49, %v857_v52 }
 0x1e3   : > { %v852_v56 = vsel %vm851_vm11, %v685_v13, %v850_v53  ;;  %v859_v57 = vmul.f32 0.5, %v858_v54  ;;  %v878_v13 = vand.u32 2147483648, %v687_v50 }
 0x1e4   : > { %v855_v58 = vsel %vm853_vm12, %v854_v55, %v852_v56 }
 0x1e5   : > { %v894_v59 = vsub.f32 %v1606_v10, %v855_v58  ;;  %v860_v60 = vsub.f32 1.5, %v859_v57 }
 0x1e6   : > { %v1253_v61 = vpop.eup %1252 }
 0x1e7   : > { %v910_v62 = vmax.f32 %v894_v59, 0.0  ;;  %v861_v63 = vmul.f32 %v1251_v49, %v860_v60  ;;  %v869_v0 = vmul.f32 %v1253_v61, %v687_v50 }
 0x1e9   : > { %926 = vst [vmem:[%s1611_s26 + $0x68] sm:$0xff] %v910_v62  ;;  %v862_v1 = vmul.f32 %v861_v63, %v686_v31  ;;  %v870_v2 = vmul.f32 %v1253_v61, %v869_v0 }
 0x1eb   : > { %v864_v4 = vsel %vm863_vm13, %v686_v31, %v862_v1  ;;  %v871_v5 = vmul.f32 0.5, %v870_v2 }
 0x1ec   : > { %v867_v6 = vsel %vm865_vm14, %v866_v3, %v864_v4 }
 0x1ed   : > { %v895_v7 = vsub.f32 %v1606_v10, %v867_v6  ;;  %v872_v8 = vsub.f32 1.5, %v871_v5 }
 0x1ef   : > { %v911_v9 = vmax.f32 %v895_v7, 0.0  ;;  %v873_v11 = vmul.f32 %v1253_v61, %v872_v8 }
 0x1f1   : > { %927 = vst [vmem:[%s1611_s26 + $0x70] sm:$0xff] %v911_v9  ;;  %v874_v12 = vmul.f32 %v873_v11, %v687_v50 }
 0x1f3   : > { %v876_v14 = vsel %vm875_vm15, %v687_v50, %v874_v12 }
 0x1f4   : > { %v879_v15 = vsel %vm877_vm0, %v878_v13, %v876_v14 }
 0x1f5   : > { %v896_v16 = vsub.f32 %v1606_v10, %v879_v15 }
 0x1f7   : > { %v912_v17 = vmax.f32 %v896_v16, 0.0 }
 0x1f9   : > { %928 = vst [vmem:[%s1611_s26 + $0x78] sm:$0xff] %v912_v17 }
 0x1fa   : > { %1281 = shalt.err (!%p1278_p2)
}
 0x1fb   : > { %s1383_s29 = smov 128   ;;  %s1384_s26 = smov 256  }
 0x1fc   : > { %s1385_s25 = smov 8  }
 0x1fd   : > { %1110 = dma.vmem_to_hbm [thread:$0]  (%p1521_p0), %s945_s27, 2048, %s947_s18, %s930_s11, %s1383_s29, %s1384_s26, %s1385_s25  }
 0x1fe PF: > { %p1116_p3 = scmp.ge.s32.totalorder %s1380_s30, 2  ;;  %s961_s14 = sand.u32 1, %s1336_s20  }
 0x1ff   : > { %s962_s28 = scalar_lea.sflag [#allocation6], %s961_s14 }
 0x200   : > { %p1113_p4 = pnand %p1116_p3, %p1525_p1 }
 0x202   : > { %p1114_p5 = pneg %p1113_p4 }
 0x204   : > { %1331 = dma.done.wait (%p1114_p5), %s962_s28, 2048  }
 0x205   : > { %1333 = vsyncadd (%p1114_p5), %s962_s28, 4294965248  ;;  %s19_s30 = sadd.s32 1, %s1380_s30   ;;  %s1770_s13 = sld [smem:[#allocation12_spill]] }
 0x206   : > { %p16_p6 = scmp.ge.s32.totalorder %s19_s30, 8   ;;  %s1771_s25 = sld [smem:[#allocation8_spill]] }
 0x207   : > { %s1772_s26 = sld [smem:[#allocation13_spill]]  ;;  %s1776_s20 = smov %s1340_s21 }
 0x208   : > { %s1773_s28 = sld [smem:[#allocation9_spill]]  ;;  %s1777_s21 = smov %s1344_s22 }
 0x209   : > { %s1774_s15 = sld [smem:[#allocation10_spill]]  ;;  %s1778_s22 = smov %s1515_s8 }
 0x20a   : > { %s1775_s29 = sld [smem:[#allocation11_spill]]  ;;  %s1779_s23 = smov %s1352_s24 }
 0x20b   : > { %s1780_s24 = smov %s1770_s13  ;;  %s1781_s27 = smov %s1372_s0 }
 0x20c   :  { %18 = sbr.rel (!%p16_p6) target bundleno = 9 (0x9), region = 170 }
 0x20f   : > { %s1782_s0 = smov %s1774_s15 }
 0x211   :  { %968 = vsyncpa [#allocation6], 1 }
 0x212   :  { %970 = vsyncpa [#allocation6 + $0x1], 1 }

</bundles_post_ra>
